<compile_context>
chip_gen: v5e
topology: v5e:2x2
jax: 0.10.0
libtpu: 0.0.40
codegen_flags: <defaults>
</compile_context>

<pallas_src>
import jax
import jax.numpy as jnp
from jax.experimental import pallas as pl
from jax.experimental.pallas import tpu as pltpu

OUT_ROWS = 8  # final-layer sublane padding (rows 0/1 = mu/kappa, rest zero)


def _softplus(x):
    # matches torch.nn.functional.softplus (threshold=20 -> identity above 20)
    return jnp.where(x > 20.0, x, jnp.log1p(jnp.exp(jnp.minimum(x, 20.0))))


def _round_up(x, m):
    return ((x + m - 1) // m) * m


def siamese_head_kernel(h_ref, w1_ref, b1_ref, w2_ref, b2_ref, w3_ref, b3_ref,
                        out_ref):
    # Layer 1: (H1, 2D) @ (2D, tb) -> (H1, tb), f32 accumulate.
    x = jnp.dot(w1_ref[...], h_ref[...],
                preferred_element_type=jnp.float32) + b1_ref[...]
    x = jnp.maximum(x, 0.0)                        # ReLU (Dropout = identity, eval)
    x = x.astype(jnp.bfloat16)

    # Layer 2: (H2, H1) @ (H1, tb) -> (H2, tb).
    x = jnp.dot(w2_ref[...], x,
                preferred_element_type=jnp.float32) + b2_ref[...]
    x = jnp.maximum(x, 0.0)

    # Layer 3 (kept f32 for mu precision): (8, H2) @ (H2, tb) -> (8, tb).
    raw = jnp.dot(w3_ref[...], x,
                  preferred_element_type=jnp.float32) + b3_ref[...]

    # kappa = clamp(softplus(raw_row1) + 1e-3, max=20); computed on the tiny
    # (8, tb) slab (one sublane block -> same vreg count as a single row).
    kappa = jnp.minimum(_softplus(raw) + 0.001, 20.0)

    out_ref[0:1, :] = raw[0:1, :]        # mu
    out_ref[1:2, :] = kappa[1:2, :]      # kappa


def siamese_dimenet_forward(h_s, h_t, params):
    """h_s, h_t: (B, D) f32 encoder embeddings. Returns (mu, kappa), each (B,)."""
    B, D = h_s.shape
    w1, b1, w2, b2, w3, b3 = params
    F1 = w1.shape[0]          # fusion dim = 2*D
    H1 = w1.shape[1]
    H2 = w2.shape[1]

    # Batch tile selection: avoid gross padding for small B; for large B use
    # big tiles (overhead amortization) while keeping >=2 grid steps for the
    # two v7x TensorCores. Lane dims of all blocks end up either a multiple of
    # 128 or equal to the full (padded) extent.
    if B <= 128:
        tb = _round_up(B, 8)
    else:
        tb = min(512, _round_up(pl.cdiv(B, 2), 128))
    b_pad = _round_up(B, tb)
    grid = (b_pad // tb,)

    # Wrapper-side fusion + layout plumbing (XLA fuses cast/pad/concat/transpose).
    h_cat = jnp.concatenate([h_s, h_t], axis=-1).astype(jnp.bfloat16)   # (B, 2D)
    if b_pad != B:
        h_cat = jnp.pad(h_cat, ((0, b_pad - B), (0, 0)))
    h_cat_t = h_cat.T                                                   # (2D, b_pad)

    # Transposed weights: bf16 for layers 1-2 (MXU), f32 for the final layer.
    w1_t = w1.T.astype(jnp.bfloat16)                                    # (H1, 2D)
    b1_t = b1.reshape(1, H1).T.astype(jnp.float32)                      # (H1, 1)
    w2_t = w2.T.astype(jnp.bfloat16)                                    # (H2, H1)
    b2_t = b2.reshape(1, H2).T.astype(jnp.float32)                      # (H2, 1)
    w3_t = jnp.zeros((OUT_ROWS, H2), jnp.float32).at[:2, :].set(w3.T)   # (8, H2)
    b3_t = jnp.zeros((OUT_ROWS, 1), jnp.float32).at[:2, :].set(
        b3.reshape(1, 2).T)                                             # (8, 1)

    const = lambda i: (0, 0)   # weights/biases: fetched once, VMEM-resident

    out = pl.pallas_call(
        siamese_head_kernel,
        out_shape=jax.ShapeDtypeStruct((2, b_pad), jnp.float32),
        grid=grid,
        in_specs=[
            pl.BlockSpec((F1, tb), lambda i: (0, i)),     # h_cat^T tile
            pl.BlockSpec((H1, F1), const),                # w1^T
            pl.BlockSpec((H1, 1), const),                 # b1^T
            pl.BlockSpec((H2, H1), const),                # w2^T
            pl.BlockSpec((H2, 1), const),                 # b2^T
            pl.BlockSpec((OUT_ROWS, H2), const),          # w3^T (row-padded)
            pl.BlockSpec((OUT_ROWS, 1), const),           # b3^T (row-padded)
        ],
        out_specs=pl.BlockSpec((2, tb), lambda i: (0, i)),
        compiler_params=pltpu.CompilerParams(
            dimension_semantics=("parallel",)),
    )(h_cat_t, w1_t, b1_t, w2_t, b2_t, w3_t, b3_t)

    return out[0, :B], out[1, :B]


def init_params(key, D, head_hidden_dims=(256, 128), fusion="cat"):
    fusion_dim = 2 * D if fusion == "cat" else 4 * D
    dims = [fusion_dim, *head_hidden_dims, 2]
    params = []
    for i in range(len(dims) - 1):
        key, kw = jax.random.split(key)
        scale = 1.0 / jnp.sqrt(dims[i])
        w = jax.random.uniform(kw, (dims[i], dims[i + 1]), jnp.float32, -scale, scale)
        b = jnp.zeros((1, dims[i + 1]), jnp.float32)
        params += [w, b]
    return tuple(params)


def reference_forward(h_s, h_t, params):
    # Pure f32 reference matching the PyTorch module semantics.
    w1, b1, w2, b2, w3, b3 = params
    fused = jnp.concatenate([h_s, h_t], axis=-1)
    x = jnp.maximum(fused @ w1 + b1, 0.0)
    x = jnp.maximum(x @ w2 + b2, 0.0)
    raw = x @ w3 + b3
    mu = raw[:, 0]
    kappa = jnp.minimum(jax.nn.softplus(raw[:, 1]) + 0.001, 20.0)
    return mu, kappa


def _check(B, D, seed):
    key = jax.random.PRNGKey(seed)
    k_hs, k_ht, k_p = jax.random.split(key, 3)
    h_s = jax.random.normal(k_hs, (B, D), jnp.float32)   # encoder(batch_s)
    h_t = jax.random.normal(k_ht, (B, D), jnp.float32)   # encoder(batch_t)
    params = init_params(k_p, D)

    mu, kappa = siamese_dimenet_forward(h_s, h_t, params)
    jax.block_until_ready((mu, kappa))

    mu_ref, kappa_ref = reference_forward(h_s, h_t, params)
    # bf16 matmul operands in layers 1-2 -> relaxed tolerance vs f32 reference.
    assert jnp.allclose(mu, mu_ref, atol=5e-2, rtol=5e-2), (mu, mu_ref)
    assert jnp.allclose(kappa, kappa_ref, atol=5e-2, rtol=5e-2), (kappa, kappa_ref)
    assert jnp.all(kappa > 0.0) and jnp.all(kappa <= 20.0)
    assert mu.shape == (B,) and kappa.shape == (B,)


if __name__ == "__main__":
    _check(B=8, D=64, seed=0)      # small batch, single-tile path
    _check(B=272, D=64, seed=0)    # multi-tile path (grid > 1, batch padding)
    print("KERNEL_OK")
</pallas_src>

<mosaic_0001>
module attributes {stable_mosaic.version = 11 : i64} {
  func.func @siamese_head_kernel(%arg0: i32, %arg1: memref<128x8xbf16, #tpu.memory_space<vmem>>, %arg2: memref<256x128xbf16, #tpu.memory_space<vmem>>, %arg3: memref<256x1xf32, #tpu.memory_space<vmem>>, %arg4: memref<128x256xbf16, #tpu.memory_space<vmem>>, %arg5: memref<128x1xf32, #tpu.memory_space<vmem>>, %arg6: memref<8x128xf32, #tpu.memory_space<vmem>>, %arg7: memref<8x1xf32, #tpu.memory_space<vmem>>, %arg8: memref<2x8xf32, #tpu.memory_space<vmem>>) attributes {dimension_semantics = [#tpu.dimension_semantics<parallel>], iteration_bounds = array<i64: 1>, scalar_prefetch = 0 : i64, scratch_operands = 0 : i64, tpu.core_type = #tpu.core_type<tc>, window_params = [{transform_indices = @transform_0, window_bounds = array<i64: 128, 8>}, {pipeline_mode = #tpu.pipeline_mode<synchronous>, transform_indices = @transform_1, window_bounds = array<i64: 256, 128>}, {pipeline_mode = #tpu.pipeline_mode<synchronous>, transform_indices = @transform_2, window_bounds = array<i64: 256, 1>}, {pipeline_mode = #tpu.pipeline_mode<synchronous>, transform_indices = @transform_3, window_bounds = array<i64: 128, 256>}, {pipeline_mode = #tpu.pipeline_mode<synchronous>, transform_indices = @transform_4, window_bounds = array<i64: 128, 1>}, {pipeline_mode = #tpu.pipeline_mode<synchronous>, transform_indices = @transform_5, window_bounds = array<i64: 8, 128>}, {pipeline_mode = #tpu.pipeline_mode<synchronous>, transform_indices = @transform_6, window_bounds = array<i64: 8, 1>}, {transform_indices = @transform_7, window_bounds = array<i64: 2, 8>}]} {
    %c0 = arith.constant 0 : index
    %c0_0 = arith.constant 0 : index
    %0 = vector.load %arg2[%c0, %c0_0] : memref<256x128xbf16, #tpu.memory_space<vmem>>, vector<256x128xbf16>
    %c0_1 = arith.constant 0 : index
    %c0_2 = arith.constant 0 : index
    %1 = vector.load %arg1[%c0_1, %c0_2] : memref<128x8xbf16, #tpu.memory_space<vmem>>, vector<128x8xbf16>
    %cst = arith.constant dense<0.000000e+00> : vector<256x8xf32>
    %2 = tpu.matmul %0, %1, %cst {dimension_numbers = #tpu.dot_dimension_numbers<[1], [0], [0], [1], [0, 0, 1, 1], [], []>} : vector<256x128xbf16>, vector<128x8xbf16>, vector<256x8xf32> -> vector<256x8xf32>
    %c0_3 = arith.constant 0 : index
    %c0_4 = arith.constant 0 : index
    %3 = vector.load %arg3[%c0_3, %c0_4] : memref<256x1xf32, #tpu.memory_space<vmem>>, vector<256x1xf32>
    %4 = vector.broadcast %3 : vector<256x1xf32> to vector<256x8xf32>
    %5 = arith.addf %2, %4 : vector<256x8xf32>
    %cst_5 = arith.constant 0.000000e+00 : f32
    %6 = vector.broadcast %cst_5 : f32 to vector<256x8xf32>
    %7 = arith.maximumf %5, %6 : vector<256x8xf32>
    %8 = arith.truncf %7 : vector<256x8xf32> to vector<256x8xbf16>
    %c0_6 = arith.constant 0 : index
    %c0_7 = arith.constant 0 : index
    %9 = vector.load %arg4[%c0_6, %c0_7] : memref<128x256xbf16, #tpu.memory_space<vmem>>, vector<128x256xbf16>
    %cst_8 = arith.constant dense<0.000000e+00> : vector<128x8xf32>
    %10 = tpu.matmul %9, %8, %cst_8 {dimension_numbers = #tpu.dot_dimension_numbers<[1], [0], [0], [1], [0, 0, 1, 1], [], []>} : vector<128x256xbf16>, vector<256x8xbf16>, vector<128x8xf32> -> vector<128x8xf32>
    %c0_9 = arith.constant 0 : index
    %c0_10 = arith.constant 0 : index
    %11 = vector.load %arg5[%c0_9, %c0_10] : memref<128x1xf32, #tpu.memory_space<vmem>>, vector<128x1xf32>
    %12 = vector.broadcast %11 : vector<128x1xf32> to vector<128x8xf32>
    %13 = arith.addf %10, %12 : vector<128x8xf32>
    %cst_11 = arith.constant 0.000000e+00 : f32
    %14 = vector.broadcast %cst_11 : f32 to vector<128x8xf32>
    %15 = arith.maximumf %13, %14 : vector<128x8xf32>
    %c0_12 = arith.constant 0 : index
    %c0_13 = arith.constant 0 : index
    %16 = vector.load %arg6[%c0_12, %c0_13] : memref<8x128xf32, #tpu.memory_space<vmem>>, vector<8x128xf32>
    %cst_14 = arith.constant dense<0.000000e+00> : vector<8x8xf32>
    %17 = tpu.matmul %16, %15, %cst_14 {dimension_numbers = #tpu.dot_dimension_numbers<[1], [0], [0], [1], [0, 0, 1, 1], [], []>} : vector<8x128xf32>, vector<128x8xf32>, vector<8x8xf32> -> vector<8x8xf32>
    %c0_15 = arith.constant 0 : index
    %c0_16 = arith.constant 0 : index
    %18 = vector.load %arg7[%c0_15, %c0_16] : memref<8x1xf32, #tpu.memory_space<vmem>>, vector<8x1xf32>
    %19 = vector.broadcast %18 : vector<8x1xf32> to vector<8x8xf32>
    %20 = arith.addf %17, %19 : vector<8x8xf32>
    %cst_17 = arith.constant 2.000000e+01 : f32
    %21 = vector.broadcast %cst_17 : f32 to vector<8x8xf32>
    %22 = arith.cmpf ogt, %20, %21 : vector<8x8xf32>
    %cst_18 = arith.constant 2.000000e+01 : f32
    %23 = vector.broadcast %cst_18 : f32 to vector<8x8xf32>
    %24 = arith.minimumf %20, %23 : vector<8x8xf32>
    %25 = math.exp %24 : vector<8x8xf32>
    %26 = math.log1p %25 : vector<8x8xf32>
    %27 = arith.select %22, %20, %26 : vector<8x8xi1>, vector<8x8xf32>
    %cst_19 = arith.constant 1.000000e-03 : f32
    %28 = vector.broadcast %cst_19 : f32 to vector<8x8xf32>
    %29 = arith.addf %27, %28 : vector<8x8xf32>
    %cst_20 = arith.constant 2.000000e+01 : f32
    %30 = vector.broadcast %cst_20 : f32 to vector<8x8xf32>
    %31 = arith.minimumf %29, %30 : vector<8x8xf32>
    %32 = vector.extract_strided_slice %20 {offsets = [0, 0], sizes = [1, 8], strides = [1, 1]} : vector<8x8xf32> to vector<1x8xf32>
    %c0_21 = arith.constant 0 : index
    %c0_22 = arith.constant 0 : index
    %33 = vector.load %arg8[%c0_21, %c0_22] : memref<2x8xf32, #tpu.memory_space<vmem>>, vector<1x8xf32>
    tpu.vector_store %arg8[%c0_21, %c0_22], %32 {strides = array<i32>} : memref<2x8xf32, #tpu.memory_space<vmem>>, vector<1x8xf32>,
    %34 = vector.extract_strided_slice %31 {offsets = [1, 0], sizes = [1, 8], strides = [1, 1]} : vector<8x8xf32> to vector<1x8xf32>
    %c1 = arith.constant 1 : index
    %c0_23 = arith.constant 0 : index
    %35 = vector.load %arg8[%c1, %c0_23] : memref<2x8xf32, #tpu.memory_space<vmem>>, vector<1x8xf32>
    tpu.vector_store %arg8[%c1, %c0_23], %34 {strides = array<i32>} : memref<2x8xf32, #tpu.memory_space<vmem>>, vector<1x8xf32>,
    return
  }
  func.func @transform_0(%arg0: i32) -> (i32, i32) {
    %c0_i32 = arith.constant 0 : i32
    %c0_i32_0 = arith.constant 0 : i32
    return %c0_i32, %arg0 : i32, i32
  }
  func.func @transform_1(%arg0: i32) -> (i32, i32) {
    %c0_i32 = arith.constant 0 : i32
    %c0_i32_0 = arith.constant 0 : i32
    %c0_i32_1 = arith.constant 0 : i32
    return %c0_i32, %c0_i32_0 : i32, i32
  }
  func.func @transform_2(%arg0: i32) -> (i32, i32) {
    %c0_i32 = arith.constant 0 : i32
    %c0_i32_0 = arith.constant 0 : i32
    %c0_i32_1 = arith.constant 0 : i32
    return %c0_i32, %c0_i32_0 : i32, i32
  }
  func.func @transform_3(%arg0: i32) -> (i32, i32) {
    %c0_i32 = arith.constant 0 : i32
    %c0_i32_0 = arith.constant 0 : i32
    %c0_i32_1 = arith.constant 0 : i32
    return %c0_i32, %c0_i32_0 : i32, i32
  }
  func.func @transform_4(%arg0: i32) -> (i32, i32) {
    %c0_i32 = arith.constant 0 : i32
    %c0_i32_0 = arith.constant 0 : i32
    %c0_i32_1 = arith.constant 0 : i32
    return %c0_i32, %c0_i32_0 : i32, i32
  }
  func.func @transform_5(%arg0: i32) -> (i32, i32) {
    %c0_i32 = arith.constant 0 : i32
    %c0_i32_0 = arith.constant 0 : i32
    %c0_i32_1 = arith.constant 0 : i32
    return %c0_i32, %c0_i32_0 : i32, i32
  }
  func.func @transform_6(%arg0: i32) -> (i32, i32) {
    %c0_i32 = arith.constant 0 : i32
    %c0_i32_0 = arith.constant 0 : i32
    %c0_i32_1 = arith.constant 0 : i32
    return %c0_i32, %c0_i32_0 : i32, i32
  }
  func.func @transform_7(%arg0: i32) -> (i32, i32) {
    %c0_i32 = arith.constant 0 : i32
    %c0_i32_0 = arith.constant 0 : i32
    return %c0_i32, %arg0 : i32, i32
  }
}

</mosaic_0001>

<bundles_post_ra>
// kernel: tpu_custom_call.1
= control target key start
LH: loop header
LB: loop body
LE: loop exit
PB: predicated region body
PF: predicated region fallthrough
CT: control target
= control target key end

     0   :  { %v1160_v3 = vmov 0   ;;  %s1631_s0 = inlined_call_operand.vmem [shape: bf16[128,8], index: 0, kind: input, shape index: {}]   ;;  %s1632_s1 = inlined_call_operand.vmem [shape: bf16[256,128], index: 1, kind: input, shape index: {}]   ;;  %s1633_s2 = inlined_call_operand.vmem [shape: f32[256,1], index: 2, kind: input, shape index: {}]   ;;  %s1634_s3 = inlined_call_operand.vmem [shape: bf16[128,256], index: 3, kind: input, shape index: {}]   ;;  %s1635_s4 = inlined_call_operand.vmem [shape: f32[128,1], index: 4, kind: input, shape index: {}]   ;;  %s1636_s5 = inlined_call_operand.vmem [shape: f32[8,128], index: 5, kind: input, shape index: {}]   ;;  %s1637_s6 = inlined_call_operand.vmem [shape: f32[8,1], index: 6, kind: input, shape index: {}]   ;;  %s1638_s7 = inlined_call_operand.hbm [shape: f32[2,8], index: 7, kind: output, shape index: {}]  }
   0x1   :  { %v105_v0 = vld [vmem:[%s1633_s2 + $0xf0] sm:$0xff]  ;;  %v1100_v2 = vld [vmem:[%s1631_s0 + $0x38] sm:$0xff]  ;;  %1128 = vset.pattern.permute.xlu1 %v1160_v3  ;;  %1127 = vset.pattern.permute.xlu0 %v1160_v3  ;;  %v103_v5 = vld [vmem:[%s1633_s2 + $0xe0] sm:$0xff] }
   0x2   :  { %v89_v1 = vld [vmem:[%s1633_s2 + $0x70] sm:$0xff]  ;;  %259 = vperm.xlu0 %1127, %v105_v0   ;;  %411 = vmatpush.bf16.msra.mxu0 %v1100_v2  ;;  %v106_v6 = vld [vmem:[%s1633_s2 + $0xf8] sm:$0xff]  ;;  %v1098_v8 = vld [vmem:[%s1631_s0 + $0x28] sm:$0xff] }
   0x3   :  { %179 = vperm.xlu1 %1128, %v89_v1   ;;  %1117 = vmatpush.bf16.msra.mxu3 %v1100_v2  ;;  %v1099_v4 = vld [vmem:[%s1631_s0 + $0x30] sm:$0xff]  ;;  %v90_v7 = vld [vmem:[%s1633_s2 + $0x78] sm:$0xff] }
   0x4   :  { %1129 = vset.pattern.permute.xlu2 %v1160_v3 }
   0x5   :  { %249 = vperm.xlu2 %1129, %v103_v5  }
   0x6   :  { %412 = vmatpush.bf16.msra.mxu0 %v1099_v4 }
   0x7   :  { %1118 = vmatpush.bf16.msra.mxu3 %v1099_v4 }
   0x8   :  { %12 = vsyncpa [#allocation3], 0  ;;  %v104_v9 = vld [vmem:[%s1633_s2 + $0xe8] sm:$0xff]  ;;  %v1097_v10 = vld [vmem:[%s1631_s0 + $0x20] sm:$0xff]  ;;  %vm897_vm0 = vcmask 57344   ;;  %s908_s10 = sshll.u32 %s1638_s7, 4  ;;  %s909_s10 = int_to_ptr.hbm [resolvable:$true] %s908_s10 }
   0x9   :  { %v88_v11 = vld [vmem:[%s1633_s2 + $0x68] sm:$0xff]  ;;  %v87_v12 = vld [vmem:[%s1633_s2 + $0x60] sm:$0xff]  ;;  %v1096_v13 = vld [vmem:[%s1631_s0 + $0x18] sm:$0xff]  ;;  %vm899_vm3 = vcmask 58369  }
   0xa   :  { %264 = vperm.xlu0 %1127, %v106_v6   ;;  %413 = vmatpush.bf16.msra.mxu0 %v1098_v8  ;;  %v101_v14 = vld [vmem:[%s1633_s2 + $0xd0] sm:$0xff]  ;;  %v102_v16 = vld [vmem:[%s1633_s2 + $0xd8] sm:$0xff]  ;;  %v1094_v18 = vld [vmem:[%s1631_s0 + $0x8] sm:$0xff] }
   0xb   :  { %184 = vperm.xlu1 %1128, %v90_v7   ;;  %1119 = vmatpush.bf16.msra.mxu3 %v1098_v8  ;;  %v1095_v15 = vld [vmem:[%s1631_s0 + $0x10] sm:$0xff]  ;;  %v86_v19 = vld [vmem:[%s1633_s2 + $0x58] sm:$0xff]  ;;  %v1093_v20 = vld [vmem:[%s1631_s0] sm:$0xff] }
   0xc   :  { %v85_v17 = vld [vmem:[%s1633_s2 + $0x50] sm:$0xff]  ;;  %v99_v21 = vld [vmem:[%s1633_s2 + $0xc0] sm:$0xff]  ;;  %v100_v22 = vld [vmem:[%s1633_s2 + $0xc8] sm:$0xff] }
   0xd   :  { %254 = vperm.xlu2 %1129, %v104_v9   ;;  %v1077_v23 = vld [vmem:[%s1632_s1] sm:$0xff]  ;;  %v1086_v24 = vld [vmem:[%s1632_s1 + $0x48] sm:$0xff]  ;;  %v97_v26 = vld [vmem:[%s1633_s2 + $0xb0] sm:$0xff] }
   0xe   :  { %414 = vmatpush.bf16.msra.mxu0 %v1097_v10  ;;  %v83_v25 = vld [vmem:[%s1633_s2 + $0x40] sm:$0xff]  ;;  %v84_v27 = vld [vmem:[%s1633_s2 + $0x48] sm:$0xff]  ;;  %v98_v28 = vld [vmem:[%s1633_s2 + $0xb8] sm:$0xff] }
   0xf   :  { %1120 = vmatpush.bf16.msra.mxu3 %v1097_v10  ;;  %v82_v29 = vld [vmem:[%s1633_s2 + $0x38] sm:$0xff]  ;;  %v81_v30 = vld [vmem:[%s1633_s2 + $0x30] sm:$0xff]  ;;  %v1078_v31 = vld [vmem:[%s1632_s1 + $0x8] sm:$0xff] }
  0x10   :  { %v1087_v32 = vld [vmem:[%s1632_s1 + $0x50] sm:$0xff]  ;;  %v95_v33 = vld [vmem:[%s1633_s2 + $0xa0] sm:$0xff]  ;;  %v96_v34 = vld [vmem:[%s1633_s2 + $0xa8] sm:$0xff] }
  0x11   :  { %v79_v35 = vld [vmem:[%s1633_s2 + $0x20] sm:$0xff]  ;;  %v80_v36 = vld [vmem:[%s1633_s2 + $0x28] sm:$0xff]  ;;  %v93_v37 = vld [vmem:[%s1633_s2 + $0x90] sm:$0xff] }
  0x12   :  { %169 = vperm.xlu0 %1127, %v87_v12   ;;  %415 = vmatpush.bf16.msra.mxu0 %v1096_v13  ;;  %v94_v38 = vld [vmem:[%s1633_s2 + $0x98] sm:$0xff]  ;;  %v1079_v39 = vld [vmem:[%s1632_s1 + $0x10] sm:$0xff]  ;;  %v91_v42 = vld [vmem:[%s1633_s2 + $0x80] sm:$0xff] }
  0x13   :  { %174 = vperm.xlu1 %1128, %v88_v11   ;;  %1121 = vmatpush.bf16.msra.mxu3 %v1096_v13  ;;  %v1088_v40 = vld [vmem:[%s1632_s1 + $0x58] sm:$0xff]  ;;  %v77_v41 = vld [vmem:[%s1633_s2 + $0x10] sm:$0xff]  ;;  %v92_v44 = vld [vmem:[%s1633_s2 + $0x88] sm:$0xff] }
  0x14   :  { %v78_v43 = vld [vmem:[%s1633_s2 + $0x18] sm:$0xff]  ;;  %v76_v45 = vld [vmem:[%s1633_s2 + $0x8] sm:$0xff]  ;;  %v75_v46 = vld [vmem:[%s1633_s2] sm:$0xff] }
  0x15   :  { %239 = vperm.xlu2 %1129, %v101_v14   ;;  %v1080_v47 = vld [vmem:[%s1632_s1 + $0x18] sm:$0xff]  ;;  %v1089_v48 = vld [vmem:[%s1632_s1 + $0x60] sm:$0xff]  ;;  %v577_v50 = vld [vmem:[%s1635_s4 + $0x68] sm:$0xff] }
  0x16   :  { %416 = vmatpush.bf16.msra.mxu0 %v1095_v15  ;;  %v579_v49 = vld [vmem:[%s1635_s4 + $0x78] sm:$0xff]  ;;  %v578_v51 = vld [vmem:[%s1635_s4 + $0x70] sm:$0xff]  ;;  %v576_v52 = vld [vmem:[%s1635_s4 + $0x60] sm:$0xff] }
  0x17   :  { %1122 = vmatpush.bf16.msra.mxu3 %v1095_v15  ;;  %v574_v53 = vld [vmem:[%s1635_s4 + $0x50] sm:$0xff]  ;;  %v575_v54 = vld [vmem:[%s1635_s4 + $0x58] sm:$0xff]  ;;  %v1081_v55 = vld [vmem:[%s1632_s1 + $0x20] sm:$0xff] }
  0x18   :  { %v1090_v56 = vld [vmem:[%s1632_s1 + $0x68] sm:$0xff]  ;;  %v571_v58 = vld [vmem:[%s1635_s4 + $0x38] sm:$0xff]  ;;  %v572_v59 = vld [vmem:[%s1635_s4 + $0x40] sm:$0xff] }
  0x19   :  { %v573_v57 = vld [vmem:[%s1635_s4 + $0x48] sm:$0xff]  ;;  %v570_v61 = vld [vmem:[%s1635_s4 + $0x30] sm:$0xff]  ;;  %v568_v62 = vld [vmem:[%s1635_s4 + $0x20] sm:$0xff] }
  0x1a   :  { %244 = vperm.xlu0 %1127, %v102_v16   ;;  %417 = vmatpush.bf16.msra.mxu0 %v1094_v18  ;;  %v569_v63 = vld [vmem:[%s1635_s4 + $0x28] sm:$0xff]  ;;  %v1091_v1 = vld [vmem:[%s1632_s1 + $0x70] sm:$0xff]  ;;  %v567_v3 = vld [vmem:[%s1635_s4 + $0x18] sm:$0xff] }
  0x1b   :  { %159 = vperm.xlu1 %1128, %v85_v17   ;;  %1123 = vmatpush.bf16.msra.mxu3 %v1094_v18  ;;  %v1082_v0 = vld [vmem:[%s1632_s1 + $0x28] sm:$0xff]  ;;  %v566_v7 = vld [vmem:[%s1635_s4 + $0x10] sm:$0xff]  ;;  %v564_v8 = vld [vmem:[%s1635_s4] sm:$0xff] }
  0x1c   :  { %v565_v6 = vld [vmem:[%s1635_s4 + $0x8] sm:$0xff]  ;;  %v855_v12 = vld [vmem:[%s1637_s6] sm:$0xff]  ;;  %v1083_v13 = vld [vmem:[%s1632_s1 + $0x30] sm:$0xff] }
  0x1d   :  { %164 = vperm.xlu2 %1129, %v86_v19   ;;  %v1092_v14 = vld [vmem:[%s1632_s1 + $0x78] sm:$0xff] }
  0x1e   :  { %418 = vmatpush.bf16.msra.mxu0 %v1093_v20 }
  0x1f   :  { %1124 = vmatpush.bf16.msra.mxu3 %v1093_v20 }
  0x21   :  { %419 = vmatmul.bf16.vlgmr.msra.gmra.mxu0 %v1077_v23 }
  0x22   :  { %229 = vperm.xlu0 %1127, %v99_v21   ;;  %464 = vmatmul.bf16.vlgmr.msra.gmra.mxu3 %v1086_v24  ;;  %v1084_v21 = vld [vmem:[%s1632_s1 + $0x38] sm:$0xff] }
  0x23   :  { %234 = vperm.xlu1 %1128, %v100_v22  }
  0x25   :  { %149 = vperm.xlu2 %1129, %v83_v25  }
  0x2a   :  { %154 = vperm.xlu0 %1127, %v84_v27   ;;  %v1085_v27 = vld [vmem:[%s1632_s1 + $0x40] sm:$0xff] }
  0x2b   :  { %219 = vperm.xlu1 %1128, %v97_v26  }
  0x2d   :  { %224 = vperm.xlu2 %1129, %v98_v28  }
  0x31   :  { %424 = vmatmul.bf16.gmra.mxu0 %v1078_v31 }
  0x32   :  { %139 = vperm.xlu0 %1127, %v81_v30   ;;  %469 = vmatmul.bf16.gmra.mxu3 %v1087_v32 }
  0x33   :  { %144 = vperm.xlu1 %1128, %v82_v29  }
  0x35   :  { %209 = vperm.xlu2 %1129, %v95_v33  }
  0x3a   :  { %214 = vperm.xlu0 %1127, %v96_v34  }
  0x3b   :  { %129 = vperm.xlu1 %1128, %v79_v35  }
  0x3d   :  { %134 = vperm.xlu2 %1129, %v80_v36  }
  0x41   :  { %429 = vmatmul.bf16.gmra.mxu0 %v1079_v39 }
  0x42   :  { %199 = vperm.xlu0 %1127, %v93_v37   ;;  %474 = vmatmul.bf16.gmra.mxu3 %v1088_v40 }
  0x43   :  { %204 = vperm.xlu1 %1128, %v94_v38  }
  0x45   :  { %119 = vperm.xlu2 %1129, %v77_v41  }
  0x4a   :  { %124 = vperm.xlu0 %1127, %v78_v43  }
  0x4b   :  { %189 = vperm.xlu1 %1128, %v91_v42  }
  0x4d   :  { %194 = vperm.xlu2 %1129, %v92_v44  }
  0x51   :  { %434 = vmatmul.bf16.gmra.mxu0 %v1080_v47 }
  0x52   :  { %109 = vperm.xlu0 %1127, %v75_v46   ;;  %479 = vmatmul.bf16.gmra.mxu3 %v1089_v48 }
  0x53   :  { %114 = vperm.xlu1 %1128, %v76_v45  }
  0x55   :  { %657 = vperm.xlu2 %1129, %v579_v49  }
  0x5a   :  { %652 = vperm.xlu0 %1127, %v578_v51  }
  0x5b   :  { %647 = vperm.xlu1 %1128, %v577_v50  }
  0x5d   :  { %642 = vperm.xlu2 %1129, %v576_v52  }
  0x5f   :  { %v1379_v60 = vpop.permute.xlu2 %249 }
  0x61   :  { %439 = vmatmul.bf16.gmra.mxu0 %v1081_v55 }
  0x62   :  { %637 = vperm.xlu0 %1127, %v575_v54   ;;  %484 = vmatmul.bf16.gmra.mxu3 %v1090_v56 }
  0x63   :  { %632 = vperm.xlu1 %1128, %v574_v53  }
  0x65   :  { %627 = vperm.xlu2 %1129, %v573_v57  }
  0x67   :  { %v1396_v2 = vpop.permute.xlu2 %254 }
  0x6a   :  { %622 = vperm.xlu0 %1127, %v572_v59  }
  0x6b   :  { %617 = vperm.xlu1 %1128, %v571_v58  }
  0x6d   :  { %612 = vperm.xlu2 %1129, %v570_v61  }
  0x6f   :  { %v1414_v9 = vpop.permute.xlu2 %239 }
  0x71   :  { %444 = vmatmul.bf16.gmra.mxu0 %v1082_v0 }
  0x72   :  { %607 = vperm.xlu0 %1127, %v569_v63   ;;  %489 = vmatmul.bf16.gmra.mxu3 %v1091_v1 }
  0x73   :  { %602 = vperm.xlu1 %1128, %v568_v62  }
  0x74   :  { %v1401_v4 = vpop.permute.xlu0 %259 }
  0x75   :  { %v1403_v5 = vpop.permute.xlu1 %179  ;;  %597 = vperm.xlu2 %1129, %v567_v3  }
  0x77   :  { %v1433_v17 = vpop.permute.xlu2 %164 }
  0x7a   :  { %592 = vperm.xlu0 %1127, %v566_v7  }
  0x7b   :  { %587 = vperm.xlu1 %1128, %v565_v6  }
  0x7c   :  { %v1416_v10 = vpop.permute.xlu0 %264 }
  0x7d   :  { %v1418_v11 = vpop.permute.xlu1 %184  ;;  %582 = vperm.xlu2 %1129, %v564_v8  }
  0x7f   :  { %v1439_v20 = vpop.permute.xlu2 %149 }
  0x81   :  { %449 = vmatmul.bf16.gmra.mxu0 %v1083_v13 }
  0x82   :  { %858 = vperm.xlu0 %1127, %v855_v12   ;;  %494 = vmatmul.bf16.gmra.mxu3 %v1092_v14 }
  0x84   :  { %v1431_v16 = vpop.permute.xlu0 %169 }
  0x85   :  { %v1429_v15 = vpop.permute.xlu1 %174 }
  0x87   :  { %v225_v24 = vpop.permute.xlu2 %224 }
  0x8c   :  { %v1435_v18 = vpop.permute.xlu0 %244 }
  0x8d   :  { %v1437_v19 = vpop.permute.xlu1 %159 }
  0x8f   :  { %v210_v29 = vpop.permute.xlu2 %209 }
  0x91   :  { %454 = vmatmul.bf16.gmra.mxu0 %v1084_v21 }
  0x94   :  { %v1444_v22 = vpop.permute.xlu0 %229 }
  0x95   :  { %v1446_v23 = vpop.permute.xlu1 %234 }
  0x97   :  { %v135_v36 = vpop.permute.xlu2 %134 }
  0x9c   :  { %v1448_v26 = vpop.permute.xlu0 %154 }
  0x9d   :  { %v220_v25 = vpop.permute.xlu1 %219 }
  0x9e   :  { %v420_v28 = vpop.f32.mrf.mxu0 }
  0x9f   :  { %v120_v46 = vpop.permute.xlu2 %119 }
  0xa1   :  { %459 = vmatmul.bf16.gmra.mxu0 %v1085_v27 }
  0xa4   :  { %v140_v31 = vpop.permute.xlu0 %139 }
  0xa5   :  { %v145_v30 = vpop.permute.xlu1 %144  ;;  %v465_v32 = vpop.f32.mrf.mxu3 }
  0xa6   :  { %v422_v33 = vpop.f32.mrf.mxu0 }
  0xac   :  { %v215_v34 = vpop.permute.xlu0 %214 }
  0xad   :  { %v130_v35 = vpop.permute.xlu1 %129  ;;  %v467_v37 = vpop.f32.mrf.mxu3 }
  0xae   :  { %v425_v38 = vpop.f32.mrf.mxu0 }
  0xaf   :  { %v426_v49 = vadd.f32 %v425_v38, %v120_v46 }
  0xb1   :  { %v502_v55 = vmax.f32 %v426_v49, 0.0 }
  0xb4   :  { %v200_v39 = vpop.permute.xlu0 %199 }
  0xb5   :  { %v205_v40 = vpop.permute.xlu1 %204  ;;  %v466_v41 = vadd.f32 %v465_v32, %v200_v39  ;;  %v470_v43 = vpop.f32.mrf.mxu3 }
  0xb6   :  { %v468_v42 = vadd.f32 %v467_v37, %v205_v40  ;;  %v427_v47 = vpop.f32.mrf.mxu0  ;;  %v471_v52 = vadd.f32 %v470_v43, %v210_v29 }
  0xb7   :  { %v518_v44 = vmax.f32 %v466_v41, 0.0 }
  0xb8   :  { %v519_v45 = vmax.f32 %v468_v42, 0.0  ;;  %v520_v59 = vmax.f32 %v471_v52, 0.0 }
  0xba   :  { %v1453_v48 = vpack.c.bf16 %v519_v45, %v518_v44 }
  0xbc   :  { %v125_v51 = vpop.permute.xlu0 %124 }
  0xbd   :  { %v1455_v50 = vpop.permute.xlu1 %189  ;;  %v428_v53 = vadd.f32 %v427_v47, %v125_v51  ;;  %v472_v54 = vpop.f32.mrf.mxu3 }
  0xbe   :  { %v473_v57 = vadd.f32 %v472_v54, %v215_v34  ;;  %v430_v58 = vpop.f32.mrf.mxu0 }
  0xbf   :  { %v503_v56 = vmax.f32 %v428_v53, 0.0  ;;  %v431_v8 = vadd.f32 %v430_v58, %v130_v35 }
  0xc0   :  { %v521_v61 = vmax.f32 %v473_v57, 0.0 }
  0xc1   :  { %v1457_v62 = vpack.c.bf16 %v503_v56, %v502_v55  ;;  %v504_v29 = vmax.f32 %v431_v8, 0.0 }
  0xc2   :  { %v1459_v63 = vpack.c.bf16 %v521_v61, %v520_v59 }
  0xc4   :  { %v110_v1 = vpop.permute.xlu0 %109 }
  0xc5   :  { %v115_v0 = vpop.permute.xlu1 %114  ;;  %v421_v6 = vadd.f32 %v420_v28, %v110_v1  ;;  %v475_v7 = vpop.f32.mrf.mxu3 }
  0xc6   :  { %v423_v3 = vadd.f32 %v422_v33, %v115_v0  ;;  %v432_v14 = vpop.f32.mrf.mxu0  ;;  %v476_v34 = vadd.f32 %v475_v7, %v220_v25 }
  0xc7   :  { %v500_v13 = vmax.f32 %v421_v6, 0.0  ;;  %v433_v21 = vadd.f32 %v432_v14, %v135_v36 }
  0xc8   :  { %v501_v12 = vmax.f32 %v423_v3, 0.0  ;;  %v522_v41 = vmax.f32 %v476_v34, 0.0 }
  0xc9   :  { %v505_v32 = vmax.f32 %v433_v21, 0.0 }
  0xca   :  { %v1461_v27 = vpack.c.bf16 %v501_v12, %v500_v13 }
  0xcb   :  { %v1463_v37 = vpack.c.bf16 %v505_v32, %v504_v29 }
  0xcd   :  { %v477_v38 = vpop.f32.mrf.mxu3 }
  0xce   :  { %v478_v39 = vadd.f32 %v477_v38, %v225_v24  ;;  %v435_v40 = vpop.f32.mrf.mxu0 }
  0xcf   :  { %v436_v35 = vadd.f32 %v435_v40, %v140_v31 }
  0xd0   :  { %v523_v42 = vmax.f32 %v478_v39, 0.0 }
  0xd1   :  { %v506_v45 = vmax.f32 %v436_v35, 0.0 }
  0xd2   :  { %v1465_v33 = vpack.c.bf16 %v523_v42, %v522_v41 }
  0xd5   :  { %v480_v28 = vpop.f32.mrf.mxu3 }
  0xd6   :  { %v437_v43 = vpop.f32.mrf.mxu0  ;;  %v481_v32 = vadd.f32 %v480_v28, %v1444_v22 }
  0xd7   :  { %v438_v44 = vadd.f32 %v437_v43, %v145_v30 }
  0xd9   :  { %v507_v36 = vmax.f32 %v438_v44, 0.0 }
  0xdb   :  { %v1467_v46 = vpack.c.bf16 %v507_v36, %v506_v45 }
  0xdd   :  { %v482_v47 = vpop.f32.mrf.mxu3 }
  0xde   :  { %v440_v49 = vpop.f32.mrf.mxu0 }
  0xdf   :  { %v441_v45 = vadd.f32 %v440_v49, %v1439_v20  ;;  %v1101_v20 = vld [vmem:[%s1634_s3 + $0x4] sm:$0xf] }
  0xe5   :  { %v485_v25 = vpop.f32.mrf.mxu3 }
  0xe6   :  { %v442_v51 = vpop.f32.mrf.mxu0  ;;  %v486_v13 = vadd.f32 %v485_v25, %v1414_v9  ;;  %v508_v25 = vmax.f32 %v441_v45, 0.0 }
  0xed   :  { %v487_v52 = vpop.f32.mrf.mxu3 }
  0xee   :  { %v445_v53 = vpop.f32.mrf.mxu0  ;;  %v488_v7 = vadd.f32 %v487_v52, %v1435_v18 }
  0xef   :  { %v446_v22 = vadd.f32 %v445_v53, %v1437_v19  ;;  %v195_v19 = vpop.permute.xlu2 %194 }
  0xf0   :  { %v527_v21 = vmax.f32 %v488_v7, 0.0  ;;  %v1039_v7 = vld [vmem:[%s1634_s3 + $0x30] sm:$0xf] }
  0xf1   :  { %v510_v36 = vmax.f32 %v446_v22, 0.0  ;;  %v1581_v22 = vpop.permute.xlu1 %647 }
  0xf5   :  { %v490_v24 = vpop.f32.mrf.mxu3 }
  0xf6   :  { %v447_v54 = vpop.f32.mrf.mxu0  ;;  %v491_v1 = vadd.f32 %v490_v24, %v1379_v60  ;;  %v526_v60 = vmax.f32 %v486_v13, 0.0  ;;  %v1109_v13 = vld [vmem:[%s1634_s3 + $0x44] sm:$0xf] }
  0xf7   :  { %v448_v42 = vadd.f32 %v447_v54, %v1433_v17 }
  0xf8   :  { %v528_v14 = vmax.f32 %v491_v1, 0.0  ;;  %v545_v41 = vpack.c.bf16 %v527_v21, %v526_v60  ;;  %v1107_v1 = vld [vmem:[%s1634_s3 + $0x34] sm:$0xf]  ;;  %v1047_v21 = vld [vmem:[%s1634_s3 + $0x40] sm:$0xf] }
  0xf9   :  { %v511_v44 = vmax.f32 %v448_v42, 0.0  ;;  %v1063_v42 = vld [vmem:[%s1634_s3 + $0x60] sm:$0xf] }
  0xfb   :  { %v537_v17 = vpack.c.bf16 %v511_v44, %v510_v36  ;;  %v1591_v44 = vpop.permute.xlu0 %652  ;;  %v1071_v36 = vld [vmem:[%s1634_s3 + $0x70] sm:$0xf] }
  0xfd   :  { %v492_v55 = vpop.f32.mrf.mxu3 }
  0xfe   :  { %v450_v56 = vpop.f32.mrf.mxu0  ;;  %v493_v30 = vadd.f32 %v492_v55, %v1396_v2 }
  0xff   :  { %v451_v9 = vadd.f32 %v450_v56, %v1431_v16  ;;  %v1023_v56 = vld [vmem:[%s1634_s3 + $0x10] sm:$0xf] }
 0x100   :  { %v529_v8 = vmax.f32 %v493_v30, 0.0  ;;  %v1031_v30 = vld [vmem:[%s1634_s3 + $0x20] sm:$0xf] }
 0x101   :  { %v512_v28 = vmax.f32 %v451_v9, 0.0 }
 0x102   :  { %v546_v29 = vpack.c.bf16 %v529_v8, %v528_v14  ;;  %v1108_v8 = vld [vmem:[%s1634_s3 + $0x34] sm:$0xf0]  ;;  %v1049_v14 = vld [vmem:[%s1634_s3 + $0x48] sm:$0xf0] }
 0x105   :  { %v495_v57 = vpop.f32.mrf.mxu3 }
 0x106   :  { %v452_v58 = vpop.f32.mrf.mxu0  ;;  %v496_v31 = vadd.f32 %v495_v57, %v1401_v4  ;;  %v483_v4 = vadd.f32 %v482_v47, %v1446_v23  ;;  %v524_v23 = vmax.f32 %v481_v32, 0.0  ;;  %v1104_v57 = vld [vmem:[%s1634_s3 + $0x14] sm:$0xf0]  ;;  %v1057_v32 = vld [vmem:[%s1634_s3 + $0x58] sm:$0xf0] }
 0x107   :  { %v453_v34 = vadd.f32 %v452_v58, %v1429_v15  ;;  %v1105_v58 = vld [vmem:[%s1634_s3 + $0x24] sm:$0xf] }
 0x108   :  { %v530_v3 = vmax.f32 %v496_v31, 0.0  ;;  %v525_v38 = vmax.f32 %v483_v4, 0.0  ;;  %v1033_v31 = vld [vmem:[%s1634_s3 + $0x28] sm:$0xf0]  ;;  %v1052_v4 = vor.u32 %v1109_v13, %v1049_v14 }
 0x10a   :  { %v544_v15 = vpack.c.bf16 %v525_v38, %v524_v23  ;;  %v1565_v38 = vpop.permute.xlu2 %657 }
 0x10d   :  { %v497_v59 = vpop.f32.mrf.mxu3 }
 0x10e   :  { %v498_v61 = vadd.f32 %v497_v59, %v1416_v10  ;;  %v455_v0 = vpop.f32.mrf.mxu0  ;;  %v1036_v59 = vor.u32 %v1105_v58, %v1033_v31 }
 0x10f   :  { %v456_v2 = vadd.f32 %v455_v0, %v1403_v5  ;;  %v513_v5 = vmax.f32 %v453_v34, 0.0  ;;  %v1055_v34 = vld [vmem:[%s1634_s3 + $0x50] sm:$0xf] }
 0x110   :  { %v531_v6 = vmax.f32 %v498_v61, 0.0  ;;  %v1106_v61 = vld [vmem:[%s1634_s3 + $0x24] sm:$0xf0] }
 0x111   :  { %v514_v39 = vmax.f32 %v456_v2, 0.0  ;;  %v538_v16 = vpack.c.bf16 %v513_v5, %v512_v28  ;;  %v1032_v0 = vor.u32 %v1106_v61, %v1031_v30  ;;  %v1110_v2 = vld [vmem:[%s1634_s3 + $0x44] sm:$0xf0] }
 0x112   :  { %v547_v12 = vpack.c.bf16 %v531_v6, %v530_v3  ;;  %v1041_v3 = vld [vmem:[%s1634_s3 + $0x38] sm:$0xf0]  ;;  %v1573_v23 = vpop.permute.xlu2 %642  ;;  %v1114_v5 = vld [vmem:[%s1634_s3 + $0x64] sm:$0xf0] }
 0x113   :  { %v1044_v6 = vor.u32 %v1107_v1, %v1041_v3 }
 0x114   :  { %789 = vmatpush.bf16.msra.mxu2 %v547_v12  ;;  %v1040_v12 = vor.u32 %v1108_v8, %v1039_v7 }
 0x116   :  { %v457_v10 = vpop.f32.mrf.mxu0 }
 0x117   :  { %v458_v18 = vadd.f32 %v457_v10, %v1418_v11  ;;  %v443_v11 = vadd.f32 %v442_v51, %v1448_v26  ;;  %v1111_v10 = vld [vmem:[%s1634_s3 + $0x54] sm:$0xf] }
 0x118   :  { %790 = vmatpush.bf16.msra.mxu2 %v546_v29  ;;  %v1048_v29 = vor.u32 %v1110_v2, %v1047_v21  ;;  %v1060_v60 = vor.u32 %v1111_v10, %v1057_v32 }
 0x119   :  { %v515_v40 = vmax.f32 %v458_v18, 0.0  ;;  %v509_v47 = vmax.f32 %v443_v11, 0.0  ;;  %v1112_v18 = vld [vmem:[%s1634_s3 + $0x54] sm:$0xf0] }
 0x11a   :  { %v1056_v9 = vor.u32 %v1112_v18, %v1055_v34  ;;  %v1583_v28 = vpop.permute.xlu2 %627 }
 0x11b   :  { %v539_v35 = vpack.c.bf16 %v515_v40, %v514_v39  ;;  %v536_v26 = vpack.c.bf16 %v509_v47, %v508_v25  ;;  %v1113_v39 = vld [vmem:[%s1634_s3 + $0x64] sm:$0xf]  ;;  %v1065_v40 = vld [vmem:[%s1634_s3 + $0x68] sm:$0xf0]  ;;  %v1116_v47 = vld [vmem:[%s1634_s3 + $0x74] sm:$0xf0]  ;;  %v1601_v25 = vpop.permute.xlu0 %637 }
 0x11c   :  { %791 = vmatpush.bf16.msra.mxu2 %v545_v41  ;;  %v1068_v41 = vor.u32 %v1113_v39, %v1065_v40 }
 0x11d   :  { %740 = vmatpush.bf16.msra.mxu1 %v539_v35  ;;  %v1064_v35 = vor.u32 %v1114_v5, %v1063_v42 }
 0x11e   :  { %v460_v43 = vpop.f32.mrf.mxu0 }
 0x11f   :  { %v461_v53 = vadd.f32 %v460_v43, %v1455_v50  ;;  %v1073_v43 = vld [vmem:[%s1634_s3 + $0x78] sm:$0xf0] }
 0x120   :  { %792 = vmatpush.bf16.msra.mxu2 %v544_v15  ;;  %v1115_v15 = vld [vmem:[%s1634_s3 + $0x74] sm:$0xf] }
 0x121   :  { %741 = vmatpush.bf16.msra.mxu1 %v538_v16  ;;  %v516_v54 = vmax.f32 %v461_v53, 0.0  ;;  %v1076_v11 = vor.u32 %v1115_v15, %v1073_v43  ;;  %v1593_v16 = vpop.permute.xlu1 %632 }
 0x122   :  { %v613_v45 = vpop.permute.xlu2 %612 }
 0x123   :  { %v623_v53 = vpop.permute.xlu0 %622 }
 0x124   :  { %793 = vmatpush.bf16.msra.mxu2 %v1465_v33  ;;  %v1017_v33 = vld [vmem:[%s1634_s3 + $0x8] sm:$0xf0] }
 0x125   :  { %742 = vmatpush.bf16.msra.mxu1 %v537_v17  ;;  %v1020_v49 = vor.u32 %v1101_v20, %v1017_v33  ;;  %v1072_v17 = vor.u32 %v1116_v47, %v1071_v36 }
 0x126   :  { %v462_v52 = vpop.f32.mrf.mxu0 }
 0x127   :  { %v463_v24 = vadd.f32 %v462_v52, %v195_v19 }
 0x128   :  { %794 = vmatpush.bf16.msra.mxu2 %v1459_v63  ;;  %v1102_v63 = vld [vmem:[%s1634_s3 + $0x4] sm:$0xf0] }
 0x129   :  { %v517_v51 = vmax.f32 %v463_v24, 0.0  ;;  %743 = vmatpush.bf16.msra.mxu1 %v536_v26  ;;  %v618_v19 = vpop.permute.xlu1 %617 }
 0x12a   :  { %v598_v52 = vpop.permute.xlu2 %597 }
 0x12b   :  { %v540_v50 = vpack.c.bf16 %v517_v51, %v516_v54 }
 0x12c   :  { %795 = vmatpush.bf16.msra.mxu2 %v1453_v48  ;;  %v1015_v48 = vld [vmem:[%s1634_s3] sm:$0xf] }
 0x12d   :  { %744 = vmatpush.bf16.msra.mxu1 %v1467_v46  ;;  %v1016_v55 = vor.u32 %v1102_v63, %v1015_v48  ;;  %v1103_v46 = vld [vmem:[%s1634_s3 + $0x14] sm:$0xf] }
 0x130   :  { %796 = vmatpush.bf16.msra.mxu2 %v540_v50 }
 0x131   :  { %745 = vmatpush.bf16.msra.mxu1 %v1463_v37  ;;  %v1025_v37 = vld [vmem:[%s1634_s3 + $0x18] sm:$0xf0]  ;;  %v603_v26 = vpop.permute.xlu1 %602 }
 0x132   :  { %v583_v51 = vpop.permute.xlu2 %582 }
 0x133   :  { %797 = vmatmul.bf16.vlgmr.msra.gmra.mxu2 %v1020_v49  ;;  %v608_v49 = vpop.permute.xlu0 %607 }
 0x135   :  { %746 = vmatpush.bf16.msra.mxu1 %v1457_v62  ;;  %v1028_v62 = vor.u32 %v1103_v46, %v1025_v37 }
 0x139   :  { %747 = vmatpush.bf16.msra.mxu1 %v1461_v27  ;;  %v1024_v27 = vor.u32 %v1104_v57, %v1023_v56  ;;  %v588_v48 = vpop.permute.xlu1 %587 }
 0x13c   :  { %748 = vmatmul.bf16.vlgmr.msra.gmra.mxu1 %v1016_v55 }
 0x143   :  { %802 = vmatmul.bf16.gmra.mxu2 %v1028_v62  ;;  %v593_v62 = vpop.permute.xlu0 %592 }
 0x14c   :  { %753 = vmatmul.bf16.gmra.mxu1 %v1024_v27 }
 0x153   :  { %807 = vmatmul.bf16.gmra.mxu2 %v1036_v59 }
 0x15c   :  { %758 = vmatmul.bf16.gmra.mxu1 %v1032_v0 }
 0x163   :  { %812 = vmatmul.bf16.gmra.mxu2 %v1044_v6 }
 0x16c   :  { %763 = vmatmul.bf16.gmra.mxu1 %v1040_v12 }
 0x173   :  { %817 = vmatmul.bf16.gmra.mxu2 %v1052_v4 }
 0x17c   :  { %768 = vmatmul.bf16.gmra.mxu1 %v1048_v29 }
 0x183   :  { %822 = vmatmul.bf16.gmra.mxu2 %v1060_v60 }
 0x18c   :  { %773 = vmatmul.bf16.gmra.mxu1 %v1056_v9 }
 0x193   :  { %827 = vmatmul.bf16.gmra.mxu2 %v1068_v41 }
 0x19c   :  { %778 = vmatmul.bf16.gmra.mxu1 %v1064_v35 }
 0x1a3   :  { %832 = vmatmul.bf16.gmra.mxu2 %v1076_v11 }
 0x1ac   :  { %783 = vmatmul.bf16.gmra.mxu1 %v1072_v17 }
 0x1b6   :  { %v798_v24 = vpop.f32.mrf.mxu2 }
 0x1b9   :  { %v749_v54 = vpop.f32.mrf.mxu1 }
 0x1ba   :  { %v750_v20 = vadd.f32 %v749_v54, %v583_v51 }
 0x1bc   :  { %v1603_v33 = vadd.f32 %v798_v24, %v750_v20 }
 0x1be   :  { %v800_v50 = vpop.f32.mrf.mxu2 }
 0x1c1   :  { %v751_v63 = vpop.f32.mrf.mxu1 }
 0x1c2   :  { %v752_v55 = vadd.f32 %v751_v63, %v588_v48 }
 0x1c4   :  { %v1605_v46 = vadd.f32 %v800_v50, %v752_v55 }
 0x1c6   :  { %v803_v37 = vpop.f32.mrf.mxu2 }
 0x1c9   :  { %v754_v56 = vpop.f32.mrf.mxu1 }
 0x1ca   :  { %v755_v57 = vadd.f32 %v754_v56, %v593_v62 }
 0x1cc   :  { %v1607_v27 = vadd.f32 %v803_v37, %v755_v57 }
 0x1ce   :  { %v805_v58 = vpop.f32.mrf.mxu2 }
 0x1d1   :  { %v756_v31 = vpop.f32.mrf.mxu1 }
 0x1d2   :  { %v757_v59 = vadd.f32 %v756_v31, %v598_v52 }
 0x1d4   :  { %v1609_v30 = vadd.f32 %v805_v58, %v757_v59 }
 0x1d6   :  { %v808_v61 = vpop.f32.mrf.mxu2 }
 0x1d9   :  { %v759_v0 = vpop.f32.mrf.mxu1 }
 0x1da   :  { %v760_v1 = vadd.f32 %v759_v0, %v603_v26  ;;  %v840_v0 = vmax.f32 %v1607_v27, 0.0 }
 0x1dc   :  { %v1611_v3 = vadd.f32 %v808_v61, %v760_v1  ;;  %v841_v61 = vmax.f32 %v1609_v30, 0.0  ;;  %v839_v1 = vmax.f32 %v1605_v46, 0.0 }
 0x1de   :  { %v810_v6 = vpop.f32.mrf.mxu2  ;;  %v842_v59 = vmax.f32 %v1611_v3, 0.0 }
 0x1e1   :  { %v761_v7 = vpop.f32.mrf.mxu1 }
 0x1e2   :  { %v762_v8 = vadd.f32 %v761_v7, %v608_v49  ;;  %v854_v7 = vld [vmem:[%s1636_s5] sm:$0xff]  ;;  %s1161_s5 = smov [#allocation2]  }
 0x1e3   :  { %s906_s30 = sshll.u32 %s1161_s5, 4  ;;  %s907_s30 = int_to_ptr.vmem [resolvable:$true] %s906_s30 }
 0x1e4   :  { %v811_v12 = vadd.f32 %v810_v6, %v762_v8  ;;  %v838_v6 = vmax.f32 %v1603_v33, 0.0  ;;  %v859_v8 = vpop.permute.xlu0 %858 }
 0x1e6   :  { %v813_v13 = vpop.f32.mrf.mxu2 }
 0x1e9   :  { %v764_v14 = vpop.f32.mrf.mxu1 }
 0x1ea   :  { %v765_v4 = vadd.f32 %v764_v14, %v613_v45 }
 0x1ec   :  { %v814_v21 = vadd.f32 %v813_v13, %v765_v4 }
 0x1ee   :  { %v815_v2 = vpop.f32.mrf.mxu2  ;;  %v844_v31 = vmax.f32 %v814_v21, 0.0 }
 0x1f1   :  { %v766_v29 = vpop.f32.mrf.mxu1 }
 0x1f2   :  { %v767_v10 = vadd.f32 %v766_v29, %v618_v19 }
 0x1f4   :  { %v816_v32 = vadd.f32 %v815_v2, %v767_v10 }
 0x1f6   :  { %v818_v60 = vpop.f32.mrf.mxu2  ;;  %v845_v58 = vmax.f32 %v816_v32, 0.0 }
 0x1f9   :  { %v769_v34 = vpop.f32.mrf.mxu1 }
 0x1fa   :  { %v770_v18 = vadd.f32 %v769_v34, %v623_v53 }
 0x1fc   :  { %v819_v9 = vadd.f32 %v818_v60, %v770_v18 }
 0x1fe   :  { %v820_v39 = vpop.f32.mrf.mxu2 }
 0x201   :  { %v771_v40 = vpop.f32.mrf.mxu1 }
 0x206   :  { %v823_v41 = vpop.f32.mrf.mxu2 }
 0x209   :  { %v774_v42 = vpop.f32.mrf.mxu1 }
 0x20a   :  { %v775_v48 = vadd.f32 %v774_v42, %v1593_v16  ;;  %v846_v16 = vmax.f32 %v819_v9, 0.0 }
 0x20c   :  { %v824_v62 = vadd.f32 %v823_v41, %v775_v48 }
 0x20e   :  { %v825_v5 = vpop.f32.mrf.mxu2 }
 0x211   :  { %v776_v35 = vpop.f32.mrf.mxu1 }
 0x212   :  { %v777_v20 = vadd.f32 %v776_v35, %v1601_v25  ;;  %v848_v25 = vmax.f32 %v824_v62, 0.0 }
 0x214   :  { %v826_v37 = vadd.f32 %v825_v5, %v777_v20 }
 0x216   :  { %v828_v15 = vpop.f32.mrf.mxu2 }
 0x219   :  { %v779_v43 = vpop.f32.mrf.mxu1 }
 0x21a   :  { %v780_v26 = vadd.f32 %v779_v43, %v1573_v23  ;;  %v849_v23 = vmax.f32 %v826_v37, 0.0 }
 0x21c   :  { %v829_v55 = vadd.f32 %v828_v15, %v780_v26 }
 0x21e   :  { %v830_v11 = vpop.f32.mrf.mxu2 }
 0x221   :  { %v781_v36 = vpop.f32.mrf.mxu1 }
 0x222   :  { %v782_v52 = vadd.f32 %v781_v36, %v1581_v22 }
 0x224   :  { %v831_v49 = vadd.f32 %v830_v11, %v782_v52 }
 0x226   :  { %v833_v45 = vpop.f32.mrf.mxu2  ;;  %v851_v22 = vmax.f32 %v831_v49, 0.0 }
 0x229   :  { %v784_v47 = vpop.f32.mrf.mxu1 }
 0x22a   :  { %v785_v17 = vadd.f32 %v784_v47, %v1591_v44  ;;  %v772_v44 = vadd.f32 %v771_v40, %v1583_v28  ;;  %v843_v28 = vmax.f32 %v811_v12, 0.0 }
 0x22c   :  { %v834_v54 = vadd.f32 %v833_v45, %v785_v17  ;;  %v821_v56 = vadd.f32 %v820_v39, %v772_v44 }
 0x22e   :  { %v835_v24 = vpop.f32.mrf.mxu2  ;;  %v852_v63 = vmax.f32 %v834_v54, 0.0  ;;  %v847_v57 = vmax.f32 %v821_v56, 0.0 }
 0x231   :  { %v786_v19 = vpop.f32.mrf.mxu1 }
 0x232   :  { %v787_v53 = vadd.f32 %v786_v19, %v1565_v38  ;;  %v850_v38 = vmax.f32 %v829_v55, 0.0 }
 0x234   :  { %v836_v51 = vadd.f32 %v835_v24, %v787_v53 }
 0x236   :  { %v853_v50 = vmax.f32 %v836_v51, 0.0 }
 0x238   :  { %861 = vmatpush.msrb.mxu3 %v853_v50 }
 0x23a   :  { %862 = vmatpush.msrb.mxu3 %v852_v63 }
 0x23c   :  { %863 = vmatpush.msrb.mxu3 %v851_v22 }
 0x23e   :  { %864 = vmatpush.msrb.mxu3 %v850_v38 }
 0x240   :  { %865 = vmatpush.msrb.mxu3 %v849_v23 }
 0x242   :  { %866 = vmatpush.msrb.mxu3 %v848_v25 }
 0x244   :  { %867 = vmatpush.msrb.mxu3 %v847_v57 }
 0x246   :  { %868 = vmatpush.msrb.mxu3 %v846_v16 }
 0x248   :  { %869 = vmatpush.msrb.mxu3 %v845_v58 }
 0x24a   :  { %870 = vmatpush.msrb.mxu3 %v844_v31 }
 0x24c   :  { %871 = vmatpush.msrb.mxu3 %v843_v28 }
 0x24e   :  { %872 = vmatpush.msrb.mxu3 %v842_v59 }
 0x250   :  { %873 = vmatpush.msrb.mxu3 %v841_v61 }
 0x252   :  { %874 = vmatpush.msrb.mxu3 %v840_v0 }
 0x254   :  { %875 = vmatpush.msrb.mxu3 %v839_v1 }
 0x256   :  { %876 = vmatpush.msrb.mxu3 %v838_v6 }
 0x257   :  { %877 = vmatmul.f32.vlgmr.msrb.gmra.mxu3 %v854_v7 }
 0x2da   :  { %v878_v3 = vpop.f32.mrf.mxu3 }
 0x2db   :  { %v879_v12 = vadd.f32 %v878_v3, %v859_v8 }
 0x2dd   :  { %v882_v30 = vmin.f32 %v879_v12, 20.0  ;;  %898 = vst.msk [vmem:[#allocation2] sm:$0x1] %vm897_vm0, %v879_v12  ;;  %vm881_vm2 = vcmp.gt.f32.partialorder %v879_v12, 20.0 }
 0x2df   :  { %v883_v13 = vmul.f32 1.442695, %v882_v30 }
 0x2e1   :  { %1130 = vpow2.f32 %v883_v13 }
 0x2e7   :  { %v1131_v27 = vpop.eup %1130 }
 0x2e8   :  { %v885_v14 = vadd.f32 1.0, %v1131_v27  ;;  %v888_v46 = vmul.f32 -0.5, %v1131_v27  ;;  %v891_v33 = vand.u32 2147483647, %v1131_v27 }
 0x2ea   :  { %1132 = vlog2.f32 %v885_v14  ;;  %v889_v4 = vadd.f32 1.0, %v888_v46  ;;  %vm892_vm1 = vcmp.lt.f32.partialorder %v891_v33, 0.0004427343 }
 0x2ec   :  { %v890_v29 = vmul.f32 %v1131_v27, %v889_v4 }
 0x2f0   :  { %v1133_v21 = vpop.eup %1132 }
 0x2f1   :  { %v887_v2 = vmul.f32 0.6931472, %v1133_v21 }
 0x2f3   :  { %v893_v10 = vsel %vm892_vm1, %v890_v29, %v887_v2 }
 0x2f4   :  { %v894_v32 = vsel %vm881_vm2, %v879_v12, %v893_v10 }
 0x2f5   :  { %v895_v60 = vadd.f32 0.001, %v894_v32 }
 0x2f7   :  { %v896_v34 = vmin.f32 %v895_v60, 20.0 }
 0x2f9   :  { %900 = vst.msk [vmem:[#allocation2] sm:$0x2] %vm899_vm3, %v896_v34 }
 0x2fa   :  { %911 = dma.vmem_to_hbm [thread:$0]  %s907_s30, 32, %s909_s10, [#allocation3]  }
 0x2fb   :  { %1158 = dma.done.wait [#allocation3], 32  }
 0x2fc   :  { %1159 = vsyncadd [#allocation3], 4294967264 }
 0x2fd   :  { %916 = vsyncpa [#allocation3], 1 }

</bundles_post_ra>
